<compile_context>
chip_gen: v7x
topology: tpu7x:2x2x1
jax: 0.10.0
libtpu: 0.0.40
codegen_flags: <defaults>
</compile_context>

<pallas_src>
import math

import jax
import jax.numpy as jnp
from jax.experimental import pallas as pl
from jax.experimental.pallas import tpu as pltpu

_LANE = 128
_SCALE = 1.0 / (3.0 * math.log(10.0))  # folds the /3 and the log10 -> ln change


def _round_up(x, m):
    return ((x + m - 1) // m) * m


def logl1_loss(inp, tgt, *, row_tile=1024):
    """Pallas implementation of LogL1Loss(reduction='sum')."""
    assert inp.shape == tgt.shape, "input/target shapes must match"

    n = 1
    for d in inp.shape:
        n *= d
    if n == 0:
        return jnp.float32(0.0)

    xf = inp.reshape(-1)  # contiguous reshape: metadata only
    yf = tgt.reshape(-1)

    rows = pl.cdiv(n, _LANE)
    padded_n = rows * _LANE
    if padded_n != n:
        # Rare path (numel not a multiple of 128): pad <=127 zeros.
        # log10(1000*0 + 1)/3 == 0 for both tensors -> pad contributes 0.
        xf = jnp.pad(xf, (0, padded_n - n))
        yf = jnp.pad(yf, (0, padded_n - n))

    x2 = xf.reshape(rows, _LANE)
    y2 = yf.reshape(rows, _LANE)

    # Minimum sublane tile depends on element width (8 for 32-bit, 16 for
    # 16-bit, 32 for 8-bit). Keep the tile a multiple of it, and never allocate
    # a bigger block than the input actually has rows.
    min_sub = max(8, 32 // jnp.dtype(inp.dtype).itemsize)
    rt = min(_round_up(row_tile, min_sub), _round_up(rows, min_sub))
    num_blocks = pl.cdiv(rows, rt)
    ragged = (rows % rt) != 0  # static: only then do we need the row mask

    def kernel(x_ref, y_ref, out_ref):
        x = x_ref[...].astype(jnp.float32)
        y = y_ref[...].astype(jnp.float32)
        # |log10(a) - log10(b)| / 3 == |ln(a/b)| / (3 ln 10): one EUP op/elem.
        ratio = (1000.0 * x + 1.0) / (1000.0 * y + 1.0)
        val = jnp.abs(jnp.log(ratio)) * jnp.float32(_SCALE)
        if ragged:
            base = pl.program_id(0) * rt
            rid = jax.lax.broadcasted_iota(jnp.int32, (rt, _LANE), 0) + base
            val = jnp.where(rid < rows, val, 0.0)
        # Lane-parallel partial sums; the cross-lane reduce is done once in the
        # wrapper over the tiny (num_blocks, 1, 128) output.
        out_ref[...] = jnp.sum(val, axis=0, keepdims=True).reshape(1, 1, _LANE)

    partial = pl.pallas_call(
        kernel,
        out_shape=jax.ShapeDtypeStruct((num_blocks, 1, _LANE), jnp.float32),
        grid_spec=pltpu.PrefetchScalarGridSpec(
            num_scalar_prefetch=0,
            grid=(num_blocks,),
            in_specs=[
                pl.BlockSpec((rt, _LANE), lambda i: (i, 0)),
                pl.BlockSpec((rt, _LANE), lambda i: (i, 0)),
            ],
            out_specs=pl.BlockSpec((1, 1, _LANE), lambda i: (i, 0, 0)),
        ),
        compiler_params=pltpu.CompilerParams(
            dimension_semantics=("parallel",),
        ),
    )(x2, y2)

    return jnp.sum(partial)


def _reference(inp, tgt):
    x_log = jnp.log10(1000.0 * inp.astype(jnp.float32) + 1.0) / 3.0
    y_log = jnp.log10(1000.0 * tgt.astype(jnp.float32) + 1.0) / 3.0
    return jnp.sum(jnp.abs(x_log - y_log))


if __name__ == "__main__":
    key = jax.random.PRNGKey(0)

    checks = [
        # (shape, row_tile)
        ((2, 4, 16, 16), 1024),   # main NCHW case, lane-aligned, single block
        ((1, 3, 17, 19), 1024),   # numel not a multiple of 128 (pad path)
        ((1, 1, 40, 128), 16),    # ragged last row-block (exercises the mask)
    ]
    for idx, (shape, rt) in enumerate(checks):
        k1, k2 = jax.random.split(jax.random.fold_in(key, idx))
        x = jax.random.uniform(k1, shape, dtype=jnp.float32)
        y = jax.random.uniform(k2, shape, dtype=jnp.float32)
        loss = jax.block_until_ready(logl1_loss(x, y, row_tile=rt))
        ref = jax.block_until_ready(_reference(x, y))
        assert jnp.allclose(loss, ref, rtol=1e-5, atol=1e-4), (shape, loss, ref)

    print("KERNEL_OK")
</pallas_src>

<mosaic_0001>
module attributes {stable_mosaic.version = 11 : i64} {
  func.func @kernel(%arg0: i32, %arg1: memref<16x128xf32, #tpu.memory_space<vmem>>, %arg2: memref<16x128xf32, #tpu.memory_space<vmem>>, %arg3: memref<1x1x128xf32, #tpu.memory_space<vmem>>) attributes {dimension_semantics = [#tpu.dimension_semantics<parallel>], iteration_bounds = array<i64: 1>, scalar_prefetch = 0 : i64, scratch_operands = 0 : i64, tpu.core_type = #tpu.core_type<tc>, window_params = [{transform_indices = @transform_0, window_bounds = array<i64: 16, 128>}, {transform_indices = @transform_1, window_bounds = array<i64: 16, 128>}, {transform_indices = @transform_2, window_bounds = array<i64: 1, 1, 128>}]} {
    %c0 = arith.constant 0 : index
    %c0_0 = arith.constant 0 : index
    %0 = vector.load %arg1[%c0, %c0_0] : memref<16x128xf32, #tpu.memory_space<vmem>>, vector<16x128xf32>
    %c0_1 = arith.constant 0 : index
    %c0_2 = arith.constant 0 : index
    %1 = vector.load %arg2[%c0_1, %c0_2] : memref<16x128xf32, #tpu.memory_space<vmem>>, vector<16x128xf32>
    %cst = arith.constant 1.000000e+03 : f32
    %2 = vector.broadcast %cst : f32 to vector<16x128xf32>
    %3 = arith.mulf %2, %0 : vector<16x128xf32>
    %cst_3 = arith.constant 1.000000e+00 : f32
    %4 = vector.broadcast %cst_3 : f32 to vector<16x128xf32>
    %5 = arith.addf %3, %4 : vector<16x128xf32>
    %cst_4 = arith.constant 1.000000e+03 : f32
    %6 = vector.broadcast %cst_4 : f32 to vector<16x128xf32>
    %7 = arith.mulf %6, %1 : vector<16x128xf32>
    %cst_5 = arith.constant 1.000000e+00 : f32
    %8 = vector.broadcast %cst_5 : f32 to vector<16x128xf32>
    %9 = arith.addf %7, %8 : vector<16x128xf32>
    %10 = arith.divf %5, %9 : vector<16x128xf32>
    %11 = math.log %10 : vector<16x128xf32>
    %12 = math.absf %11 : vector<16x128xf32>
    %cst_6 = arith.constant 0.144764826 : f32
    %13 = vector.broadcast %cst_6 : f32 to vector<16x128xf32>
    %14 = arith.mulf %12, %13 : vector<16x128xf32>
    %cst_7 = arith.constant dense<0.000000e+00> : vector<128xf32>
    %15 = vector.multi_reduction <add>, %14, %cst_7 [0] : vector<16x128xf32> to vector<128xf32>
    %16 = vector.shape_cast %15 : vector<128xf32> to vector<1x128xf32>
    %17 = vector.shape_cast %16 : vector<1x128xf32> to vector<1x1x128xf32>
    %c0_8 = arith.constant 0 : index
    %c0_9 = arith.constant 0 : index
    %c0_10 = arith.constant 0 : index
    %18 = vector.load %arg3[%c0_8, %c0_9, %c0_10] : memref<1x1x128xf32, #tpu.memory_space<vmem>>, vector<1x1x128xf32>
    tpu.vector_store %arg3[%c0_8, %c0_9, %c0_10], %17 {strides = array<i32>} : memref<1x1x128xf32, #tpu.memory_space<vmem>>, vector<1x1x128xf32>,
    return
  }
  func.func @transform_0(%arg0: i32) -> (i32, i32) {
    %c0_i32 = arith.constant 0 : i32
    %c0_i32_0 = arith.constant 0 : i32
    return %arg0, %c0_i32 : i32, i32
  }
  func.func @transform_1(%arg0: i32) -> (i32, i32) {
    %c0_i32 = arith.constant 0 : i32
    %c0_i32_0 = arith.constant 0 : i32
    return %arg0, %c0_i32 : i32, i32
  }
  func.func @transform_2(%arg0: i32) -> (i32, i32, i32) {
    %c0_i32 = arith.constant 0 : i32
    %c0_i32_0 = arith.constant 0 : i32
    %c0_i32_1 = arith.constant 0 : i32
    return %arg0, %c0_i32, %c0_i32_0 : i32, i32, i32
  }
}

</mosaic_0001>

<bundles_post_ra>
// kernel: tpu_custom_call.1
= control target key start
LH: loop header
LB: loop body
LE: loop exit
PB: predicated region body
PF: predicated region fallthrough
CT: control target
= control target key end

     0   :  { %7 = vsyncpa [#allocation3], 0  ;;  %s229_s0 = inlined_call_operand.hbm [shape: f32[16,128], index: 0, kind: input, shape index: {}]   ;;  %s230_s1 = inlined_call_operand.hbm [shape: f32[16,128], index: 1, kind: input, shape index: {}]   ;;  %s231_s2 = inlined_call_operand.hbm [shape: f32[1,1,128], index: 2, kind: output, shape index: {}]  }
   0x1   :  { %8 = vsyncpa [#allocation6], 0 }
   0x2   :  { %9 = vsyncpa [#allocation4], 0  ;;  %s173_s9 = smov [#allocation2]   ;;  %s101_s13 = scalar_lea.hbm %s229_s0, 256 }
   0x3   :  { %s15_s10 = sshll.u32 %s173_s9, 4  ;;  %p102_p0 = scmp.ne.s32.totalorder %s229_s0, %s101_s13  ;;  %s16_s10 = int_to_ptr.vmem [resolvable:$true] %s15_s10 }
   0x4   :  { %p105_p1 = scmp.lt.u32.totalorder %s101_s13, %s229_s0 }
   0x6   :  { %p107_p2 = pnand %p105_p1, %p102_p0 }
   0x8   :  { %110 = shalt.err (!%p107_p2)
}
   0x9   :  { %s111_s18 = scalar_lea.vmem %s16_s10, 256  ;;  %p116_p4 = scmp.lt.s32.totalorder %s16_s10, %s16_s10 }
   0xa   :  { %p112_p3 = scmp.ne.s32.totalorder %s16_s10, %s111_s18  ;;  %p117_p5 = scmp.lt.s32.totalorder %s111_s18, %s111_s18 }
   0xc   :  { %p118_p6 = por %p117_p5, %p116_p4 }
   0xe   :  { %p119_p7 = pnand %p118_p6, %p112_p3 }
  0x10   :  { %122 = shalt.err (!%p119_p7)
}
  0x11   :  { %s174_s19 = smov 128   ;;  %s175_s20 = smov 8  }
  0x12   :  { %21 = dma.hbm_to_vmem [thread:$0]  %s229_s0, 256, %s16_s10, [#allocation3], %s174_s19, %s174_s19, %s175_s20  }
  0x13   :  { %s176_s23 = smov [#allocation5]   ;;  %s123_s27 = scalar_lea.hbm %s230_s1, 256 }
  0x14   :  { %s27_s24 = sshll.u32 %s176_s23, 4  ;;  %p124_p8 = scmp.ne.s32.totalorder %s230_s1, %s123_s27  ;;  %s28_s24 = int_to_ptr.vmem [resolvable:$true] %s27_s24 }
  0x15   :  { %p127_p9 = scmp.lt.u32.totalorder %s123_s27, %s230_s1 }
  0x17   :  { %p129_p10 = pnand %p127_p9, %p124_p8 }
  0x19   :  { %132 = shalt.err (!%p129_p10)
}
  0x1a   :  { %s133_s4 = scalar_lea.vmem %s28_s24, 256  ;;  %p138_p12 = scmp.lt.s32.totalorder %s28_s24, %s28_s24 }
  0x1b   :  { %p134_p11 = scmp.ne.s32.totalorder %s28_s24, %s133_s4  ;;  %p139_p13 = scmp.lt.s32.totalorder %s133_s4, %s133_s4 }
  0x1d   :  { %p140_p0 = por %p139_p13, %p138_p12 }
  0x1f   :  { %p141_p1 = pnand %p140_p0, %p134_p11 }
  0x21   :  { %144 = shalt.err (!%p141_p1)
}
  0x22   :  { %33 = dma.hbm_to_vmem [thread:$0]  %s230_s1, 256, %s28_s24, [#allocation6], %s174_s19, %s174_s19, %s175_s20  }
  0x23   :  { %167 = dma.done.wait [#allocation3], 256  }
  0x24   :  { %168 = vsyncadd [#allocation3], 4294967040 }
  0x25   :  { %169 = dma.done.wait [#allocation6], 256  }
  0x26   :  { %170 = vsyncadd [#allocation6], 4294967040  ;;  %v42_v0 = vld [vmem:[#allocation5] sm:$0xff]  ;;  %v43_v1 = vld [vmem:[#allocation5 + $0x8] sm:$0xff]  ;;  %s177_s1 = smov [#allocation7]  }
  0x27   :  { %v48_v2 = vmul.f32 1000.0, %v42_v0  ;;  %v49_v3 = vmul.f32 1000.0, %v43_v1  ;;  %v40_v6 = vld [vmem:[#allocation2] sm:$0xff]  ;;  %v41_v7 = vld [vmem:[#allocation2 + $0x8] sm:$0xff]  ;;  %s78_s6 = sshll.u32 %s177_s1, 4  ;;  %s79_s6 = int_to_ptr.vmem [resolvable:$true] %s78_s6 }
  0x28   :  { %v44_v8 = vmul.f32 1000.0, %v40_v6  ;;  %v45_v9 = vmul.f32 1000.0, %v41_v7  ;;  %s145_s7 = scalar_lea.vmem %s79_s6, 16  ;;  %s149_s8 = scalar_lea.vmem %s79_s6, 32 }
  0x29   :  { %v50_v4 = vadd.f32 1.0, %v48_v2  ;;  %v51_v5 = vadd.f32 1.0, %v49_v3  ;;  %p146_p2 = scmp.ne.s32.totalorder %s79_s6, %s145_s7  ;;  %p150_p3 = scmp.lt.s32.totalorder %s79_s6, %s79_s6 }
  0x2a   :  { %v46_v10 = vadd.f32 1.0, %v44_v8  ;;  %v47_v11 = vadd.f32 1.0, %v45_v9  ;;  %p151_p4 = scmp.lt.s32.totalorder %s149_s8, %s145_s7 }
  0x2b   :  { %93 = vrcp.f32 %v50_v4 }
  0x2c   :  { %95 = vrcp.f32 %v51_v5  ;;  %p152_p5 = por %p151_p4, %p150_p3 }
  0x2e   :  { %p153_p6 = pnand %p152_p5, %p146_p2 }
  0x35   :  { %v94_v12 = vpop.eup %93 }
  0x36   :  { %v96_v13 = vpop.eup %95  ;;  %v53_v14 = vmul.f32 %v94_v12, %v46_v10 }
  0x37   :  { %v55_v15 = vmul.f32 %v96_v13, %v47_v11 }
  0x38   :  { %97 = vlog2.f32 %v53_v14 }
  0x39   :  { %99 = vlog2.f32 %v55_v15 }
  0x42   :  { %v98_v16 = vpop.eup %97 }
  0x43   :  { %v100_v17 = vpop.eup %99  ;;  %v57_v18 = vmul.f32 0.6931472, %v98_v16 }
  0x44   :  { %v59_v19 = vmul.f32 0.6931472, %v100_v17 }
  0x45   :  { %v60_v20 = vand.u32 2147483647, %v57_v18 }
  0x46   :  { %v61_v21 = vand.u32 2147483647, %v59_v19 }
  0x47   :  { %v62_v22 = vmul.f32 0.14476483, %v60_v20 }
  0x48   :  { %v63_v23 = vmul.f32 0.14476483, %v61_v21 }
  0x4a   :  { %v64_v24 = vadd.f32 %v63_v23, %v62_v22 }
  0x4c   :  { %v65_v25 = vrot.slane %v64_v24, 4 }
  0x4e   :  { %v66_v26 = vadd.f32 %v65_v25, %v64_v24 }
  0x50   :  { %v67_v27 = vrot.slane %v66_v26, 2 }
  0x52   :  { %v68_v28 = vadd.f32 %v67_v27, %v66_v26 }
  0x54   :  { %v69_v29 = vrot.slane %v68_v28, 1 }
  0x56   :  { %v70_v30 = vadd.f32 %v69_v29, %v68_v28 }
  0x58   :  { %71 = vst [vmem:[#allocation7] sm:$0x1] %v70_v30 }
  0x59   :  { %156 = shalt.err (!%p153_p6)
}
  0x5a   :  { %s157_s11 = scalar_lea.hbm %s231_s2, 16 }
  0x5b   :  { %p158_p7 = scmp.ne.s32.totalorder %s231_s2, %s157_s11  ;;  %p161_p8 = scmp.lt.u32.totalorder %s157_s11, %s231_s2 }
  0x5d   :  { %p163_p9 = pnand %p161_p8, %p158_p7 }
  0x5f   :  { %166 = shalt.err (!%p163_p9)
}
  0x60   :  { %81 = dma.vmem_to_hbm [thread:$0]  %s79_s6, 16, %s231_s2, [#allocation4]  }
  0x61   :  { %171 = dma.done.wait [#allocation4], 16  }
  0x62   :  { %172 = vsyncadd [#allocation4], 4294967280 }
  0x63   :  { %85 = vsyncpa [#allocation3], 1 }
  0x64   :  { %86 = vsyncpa [#allocation6], 1 }
  0x65   :  { %87 = vsyncpa [#allocation4], 1 }

</bundles_post_ra>
